<compile_context>
chip_gen: v5e
topology: v5e:2x2
jax: 0.10.0
libtpu: 0.0.40
codegen_flags: <defaults>
</compile_context>

<pallas_src>
import functools

import numpy as np

import jax
import jax.numpy as jnp
from jax.experimental import pallas as pl
from jax.experimental.pallas import tpu as pltpu


def _round_up(x, m):
    return (x + m - 1) // m * m


def _tpu_generation():
    """Best-effort (vmem_capacity_bytes, lower-cased device_kind)."""
    kind = ""
    try:
        kind = jax.devices()[0].device_kind.lower()
    except Exception:
        pass
    vmem_cap = None
    try:
        vmem_cap = int(pltpu.get_tpu_info().vmem_capacity_bytes)
    except Exception:
        vmem_cap = None
    if not vmem_cap or vmem_cap <= 0:
        vmem_cap = (64 << 20) if "v7" in kind else (128 << 20)
    return vmem_cap, kind


def _argmin_onehot_store(dist, out_ref):
    # First-occurrence argmin (torch tie-breaking) via min + masked iota,
    # then lane-dense one_hot * 1000 store.
    kp = dist.shape[-1]
    min_d = jnp.min(dist, axis=-1, keepdims=True)                     # (TN, 1)
    lane = jax.lax.broadcasted_iota(jnp.int32, dist.shape, 1)         # (TN, Kp)
    idx = jnp.min(jnp.where(dist == min_d, lane, kp),
                  axis=-1, keepdims=True)                             # (TN, 1)
    out_ref[...] = jnp.where(lane == idx, 1000.0, 0.0).astype(out_ref.dtype)


def _kernel_mxu_layersum(w_ref, hs_ref, m_ref, c0_ref, out_ref):
    # w_ref : SMEM (L,)          softmaxed layer weights (f32 scalars)
    # hs_ref: VMEM (L, TN, Din)  tile of stacked hidden states (native dtype)
    # m_ref : VMEM (Din, Kp)     fused matrix  W^T C^T   (bf16, resident)
    # c0_ref: VMEM (1, Kp)       ||c||^2 - 2 b.c  (+inf on pads, f32, resident)
    # Per-layer MXU dot-accumulate: the weighted layer sum never touches VPU.
    num_layers = hs_ref.shape[0]
    m = m_ref[...]
    p = w_ref[0] * jnp.dot(hs_ref[0].astype(jnp.bfloat16), m,
                           preferred_element_type=jnp.float32)        # (TN, Kp)
    for l in range(1, num_layers):
        p = p + w_ref[l] * jnp.dot(hs_ref[l].astype(jnp.bfloat16), m,
                                   preferred_element_type=jnp.float32)
    _argmin_onehot_store(c0_ref[...] - 2.0 * p, out_ref)


def _kernel_vpu_layersum(w_ref, hs_ref, m_ref, c0_ref, out_ref, *, acc_dtype):
    # Large-Kp path: single MXU matmul, weighted layer sum on the VPU
    # (bf16 accumulate on v6e/v7x, f32 on pre-v6 chips without bf16 VALU).
    num_layers = hs_ref.shape[0]
    acc = w_ref[0].astype(acc_dtype) * hs_ref[0].astype(acc_dtype)
    for l in range(1, num_layers):
        acc = acc + w_ref[l].astype(acc_dtype) * hs_ref[l].astype(acc_dtype)
    dist = c0_ref[...] - 2.0 * jnp.dot(acc.astype(jnp.bfloat16), m_ref[...],
                                       preferred_element_type=jnp.float32)
    _argmin_onehot_store(dist, out_ref)


def continue_weighted_layer_extract(hidden_states, layer_weights,
                                    lin_w, lin_b, codebook, *,
                                    tile_n_target=512):
    """hidden_states: (L, B, T, llm_dim) any float dtype; lin_w: (d, llm_dim)
    torch layout; lin_b: (d,); codebook: (k, d).
    Returns (taste_logits (B, T, k) float32, {})."""
    L, B, T, Din = hidden_states.shape
    k = codebook.shape[0]
    N = B * T

    # ---- grid-invariant precompute (exact algebraic fusion, f32 math) ----
    # dist(h, c_k) ~ ||c_k||^2 - 2 b.c_k - 2 hidden . (W^T c_k)   (||h||^2 const over k)
    lw = lin_w.astype(jnp.float32)                   # (d, Din)
    lb = lin_b.astype(jnp.float32)                   # (d,)
    cb = codebook.astype(jnp.float32)                # (k, d)
    fused_m = lw.T @ cb.T                            # (Din, k)
    fused_c0 = jnp.sum(cb * cb, axis=-1) - 2.0 * (lb @ cb.T)    # (k,)

    # Pad codebook axis to a multiple of 128 -> lane-dense output tile.
    kp = _round_up(k, 128)
    if kp != k:
        fused_m = jnp.pad(fused_m, ((0, 0), (0, kp - k)))
        fused_c0 = jnp.pad(fused_c0, (0, kp - k), constant_values=jnp.inf)
    fused_m = fused_m.astype(jnp.bfloat16)           # MXU operand: bf16
    fused_c0 = fused_c0.reshape(1, kp).astype(jnp.float32)

    w = jax.nn.softmax(layer_weights.astype(jnp.float32))       # (L,) -> SMEM

    # ---- chip-aware budgets / kernel-path selection ----
    vmem_cap, kind = _tpu_generation()
    is_pre_v6 = any(s in kind for s in ("v2", "v3", "v4", "v5"))
    vmem_limit = max(32 << 20, int(0.80 * vmem_cap))
    tile_budget = max(24 << 20, int(0.70 * vmem_cap))

    hs_bytes = jnp.dtype(hidden_states.dtype).itemsize
    # Use per-layer MXU reduction only while the extra MXU MACs stay hidden
    # under the hidden_states HBM read (rough Kp thresholds per generation).
    kp_mxu_threshold = 256 if is_pre_v6 else 640
    use_mxu_layersum = kp <= kp_mxu_threshold
    acc_dtype = jnp.float32 if is_pre_v6 else jnp.bfloat16

    # ---- token tiling: sublane-legal, VMEM-aware, pad-free when possible ----
    quantum = max(8, 32 // hs_bytes)          # sublane quantum for hs dtype
    # Full resident accounting: 2x hs tile + 2x out tile + intermediates, plus
    # single-buffered M / c0 constants.
    per_tok = (2 * L * Din * hs_bytes        # double-buffered hs tile
               + 2 * kp * 4                  # double-buffered out tile
               + Din * 4 + 3 * kp * 4)       # acc / p / dist f32 intermediates
    const_bytes = Din * kp * 2 + kp * 4      # resident bf16 M + f32 c0
    max_tile = max(quantum,
                   ((tile_budget - const_bytes) // per_tok) // quantum * quantum)
    target = max(quantum, min(int(tile_n_target), max_tile) // quantum * quantum)

    # Prefer a sublane-aligned divisor of N: avoids a wrapper-side jnp.pad pass
    # over the largest tensor.
    tile_n = None
    t = min(target, (N // quantum) * quantum)
    while t >= quantum:
        if N % t == 0:
            tile_n = t
            break
        t -= quantum
    if tile_n is None:
        # TODO(synk): handle the ragged tail in-kernel (masked rows) instead of
        # padding; only triggers when N has no sublane-aligned divisor <= target.
        tile_n = max(quantum, min(target, _round_up(N, quantum)))
    n_total = _round_up(N, tile_n)

    # v7x has 2 TensorCores per chip: make sure the "parallel" axis has >= 2 steps.
    if "v7" in kind and n_total // tile_n < 2 and tile_n > quantum:
        tile_n = max(quantum, _round_up(pl.cdiv(N, 2), quantum))
        n_total = _round_up(N, tile_n)

    # hidden_states stay in their native dtype (no wrapper-side upcast copy).
    hs = hidden_states.reshape(L, N, Din)
    if n_total != N:
        hs = jnp.pad(hs, ((0, 0), (0, n_total - N), (0, 0)))

    grid = (n_total // tile_n,)

    if use_mxu_layersum:
        kernel = _kernel_mxu_layersum
        flops = 2 * L * n_total * Din * kp
    else:
        kernel = functools.partial(_kernel_vpu_layersum, acc_dtype=acc_dtype)
        flops = 2 * n_total * Din * kp + 2 * L * n_total * Din
    cost = pl.CostEstimate(
        flops=flops,
        transcendentals=0,
        bytes_accessed=(L * n_total * Din * hs_bytes + n_total * kp * 4
                        + Din * kp * 2 + kp * 4 + L * 4),
    )

    out = pl.pallas_call(
        kernel,
        out_shape=jax.ShapeDtypeStruct((n_total, kp), jnp.float32),
        grid_spec=pltpu.PrefetchScalarGridSpec(
            num_scalar_prefetch=0,
            grid=grid,
            in_specs=[
                pl.BlockSpec(memory_space=pltpu.MemorySpace.SMEM),    # w (L,)
                pl.BlockSpec((L, tile_n, Din), lambda i: (0, i, 0)),  # hs tile
                pl.BlockSpec(memory_space=pltpu.MemorySpace.VMEM),    # fused M (resident, 1 copy)
                pl.BlockSpec(memory_space=pltpu.MemorySpace.VMEM),    # fused c0 (resident)
            ],
            out_specs=pl.BlockSpec((tile_n, kp), lambda i: (i, 0)),
        ),
        compiler_params=pltpu.CompilerParams(
            dimension_semantics=("parallel",),
            vmem_limit_bytes=vmem_limit,
        ),
        cost_estimate=cost,
    )(w, hs, fused_m, fused_c0)

    taste_logits = out[:N, :k].reshape(B, T, k)
    training_info = {}
    return taste_logits, training_info


# ------------------------- reference & checks (f32) -------------------------

def _ref_distances(hidden_states, layer_weights, lin_w, lin_b, codebook):
    w = jax.nn.softmax(layer_weights.astype(jnp.float32))
    hidden = jnp.einsum('l,lbtd->btd', w, hidden_states.astype(jnp.float32))
    h = hidden @ lin_w.T.astype(jnp.float32) + lin_b.astype(jnp.float32)
    cb = codebook.astype(jnp.float32)
    return (jnp.sum(h * h, -1, keepdims=True) - 2.0 * (h @ cb.T)
            + jnp.sum(cb * cb, -1)[None, None, :])


def _check_case(name, taste_logits, hidden_states, layer_weights,
                lin_w, lin_b, codebook):
    B, T = hidden_states.shape[1], hidden_states.shape[2]
    k = codebook.shape[0]
    assert taste_logits.shape == (B, T, k), name
    assert taste_logits.dtype == jnp.float32, name
    tl = np.asarray(jax.device_get(taste_logits))
    # structural: every row is exactly one_hot * 1000
    assert ((tl == 0.0) | (tl == 1000.0)).all(), name
    assert ((tl == 1000.0).sum(axis=-1) == 1).all(), name
    # index check vs f32 reference distances: exact match, or (near-tie) the
    # chosen code's true distance is within tolerance of the true minimum
    # (MXU runs bf16 operands, so near-tie flips are expected/allowed).
    dist = np.asarray(jax.device_get(
        _ref_distances(hidden_states, layer_weights, lin_w, lin_b, codebook)))
    kernel_idx = tl.argmax(axis=-1)
    ref_idx = dist.argmin(axis=-1)
    d_kernel = np.take_along_axis(dist, kernel_idx[..., None], -1)[..., 0]
    d_ref = dist.min(axis=-1)
    exact = kernel_idx == ref_idx
    near = (d_kernel - d_ref) <= 1e-2 * (1.0 + np.abs(d_ref))
    assert np.all(exact | near), name


if __name__ == "__main__":
    key = jax.random.PRNGKey(0)

    # ---- case 1: aligned small shapes (MXU per-layer reduction path) ----
    L, B, T = 5, 2, 8            # llm_num_hidden_layers = 4
    LLM_DIM, D, K = 64, 32, 128
    k_hs, k_w, k_b, k_cb = jax.random.split(key, 4)
    hs1 = jax.random.normal(k_hs, (L, B, T, LLM_DIM), dtype=jnp.float32)
    lw1 = jnp.ones((L,), dtype=jnp.float32)
    w1 = jax.random.normal(k_w, (D, LLM_DIM), dtype=jnp.float32) * 0.05
    b1 = jax.random.normal(k_b, (D,), dtype=jnp.float32) * 0.05
    cb1 = jax.random.normal(k_cb, (K, D), dtype=jnp.float32)
    out1, _ = continue_weighted_layer_extract(hs1, lw1, w1, b1, cb1)
    out1 = jax.block_until_ready(out1)
    _check_case("case1", out1, hs1, lw1, w1, b1, cb1)

    # ---- case 2: ragged shapes (k % 128 != 0, N % 16 != 0) ----
    L2, B2, T2 = 3, 2, 5
    LLM_DIM2, D2, K2 = 64, 32, 96
    k_hs2, k_w2, k_b2, k_cb2 = jax.random.split(jax.random.PRNGKey(1), 4)
    hs2 = jax.random.normal(k_hs2, (L2, B2, T2, LLM_DIM2), dtype=jnp.float32)
    lw2 = jnp.ones((L2,), dtype=jnp.float32)
    w2 = jax.random.normal(k_w2, (D2, LLM_DIM2), dtype=jnp.float32) * 0.05
    b2 = jax.random.normal(k_b2, (D2,), dtype=jnp.float32) * 0.05
    cb2 = jax.random.normal(k_cb2, (K2, D2), dtype=jnp.float32)
    out2, _ = continue_weighted_layer_extract(hs2, lw2, w2, b2, cb2)
    out2 = jax.block_until_ready(out2)
    _check_case("case2", out2, hs2, lw2, w2, b2, cb2)

    # ---- case 3: large codebook (exercises the VPU layer-sum / single-dot path) ----
    L3, B3, T3 = 3, 2, 8
    LLM_DIM3, D3, K3 = 64, 32, 1024
    k_hs3, k_w3, k_b3, k_cb3 = jax.random.split(jax.random.PRNGKey(2), 4)
    hs3 = jax.random.normal(k_hs3, (L3, B3, T3, LLM_DIM3), dtype=jnp.float32)
    lw3 = jnp.ones((L3,), dtype=jnp.float32)
    w3 = jax.random.normal(k_w3, (D3, LLM_DIM3), dtype=jnp.float32) * 0.05
    b3 = jax.random.normal(k_b3, (D3,), dtype=jnp.float32) * 0.05
    cb3 = jax.random.normal(k_cb3, (K3, D3), dtype=jnp.float32)
    out3, _ = continue_weighted_layer_extract(hs3, lw3, w3, b3, cb3)
    out3 = jax.block_until_ready(out3)
    _check_case("case3", out3, hs3, lw3, w3, b3, cb3)

    print("KERNEL_OK")
</pallas_src>

<mosaic_0001>
module attributes {stable_mosaic.version = 11 : i64} {
  func.func @_kernel_mxu_layersum(%arg0: i32, %arg1: memref<5xf32, #tpu.memory_space<smem>>, %arg2: memref<5x16x64xf32, #tpu.memory_space<vmem>>, %arg3: memref<64x128xbf16, #tpu.memory_space<vmem>>, %arg4: memref<1x128xf32, #tpu.memory_space<vmem>>, %arg5: memref<16x128xf32, #tpu.memory_space<vmem>>) attributes {dimension_semantics = [#tpu.dimension_semantics<parallel>], iteration_bounds = array<i64: 1>, scalar_prefetch = 0 : i64, scratch_operands = 0 : i64, tpu.core_type = #tpu.core_type<tc>, window_params = [{transform_indices = @transform_0, window_bounds = array<i64: 5>}, {transform_indices = @transform_1, window_bounds = array<i64: 5, 16, 64>}, {pipeline_mode = #tpu.pipeline_mode<synchronous>, transform_indices = @transform_2, window_bounds = array<i64: 64, 128>}, {pipeline_mode = #tpu.pipeline_mode<synchronous>, transform_indices = @transform_3, window_bounds = array<i64: 1, 128>}, {transform_indices = @transform_4, window_bounds = array<i64: 16, 128>}]} {
    %c0 = arith.constant 0 : index
    %c0_0 = arith.constant 0 : index
    %0 = vector.load %arg3[%c0, %c0_0] : memref<64x128xbf16, #tpu.memory_space<vmem>>, vector<64x128xbf16>
    %c0_1 = arith.constant 0 : index
    %1 = memref.load %arg1[%c0_1] : memref<5xf32, #tpu.memory_space<smem>>
    %c0_2 = arith.constant 0 : index
    %c0_3 = arith.constant 0 : index
    %c0_4 = arith.constant 0 : index
    %2 = vector.load %arg2[%c0_2, %c0_3, %c0_4] : memref<5x16x64xf32, #tpu.memory_space<vmem>>, vector<1x16x64xf32>
    %3 = vector.shape_cast %2 : vector<1x16x64xf32> to vector<16x64xf32>
    %4 = arith.truncf %3 : vector<16x64xf32> to vector<16x64xbf16>
    %cst = arith.constant dense<0.000000e+00> : vector<16x128xf32>
    %5 = tpu.matmul %4, %0, %cst {dimension_numbers = #tpu.dot_dimension_numbers<[1], [0], [0], [1], [0, 0, 1, 1], [], []>} : vector<16x64xbf16>, vector<64x128xbf16>, vector<16x128xf32> -> vector<16x128xf32>
    %6 = vector.broadcast %1 : f32 to vector<16x128xf32>
    %7 = arith.mulf %6, %5 : vector<16x128xf32>
    %c1 = arith.constant 1 : index
    %8 = memref.load %arg1[%c1] : memref<5xf32, #tpu.memory_space<smem>>
    %c1_5 = arith.constant 1 : index
    %c0_6 = arith.constant 0 : index
    %c0_7 = arith.constant 0 : index
    %9 = vector.load %arg2[%c1_5, %c0_6, %c0_7] : memref<5x16x64xf32, #tpu.memory_space<vmem>>, vector<1x16x64xf32>
    %10 = vector.shape_cast %9 : vector<1x16x64xf32> to vector<16x64xf32>
    %11 = arith.truncf %10 : vector<16x64xf32> to vector<16x64xbf16>
    %cst_8 = arith.constant dense<0.000000e+00> : vector<16x128xf32>
    %12 = tpu.matmul %11, %0, %cst_8 {dimension_numbers = #tpu.dot_dimension_numbers<[1], [0], [0], [1], [0, 0, 1, 1], [], []>} : vector<16x64xbf16>, vector<64x128xbf16>, vector<16x128xf32> -> vector<16x128xf32>
    %13 = vector.broadcast %8 : f32 to vector<16x128xf32>
    %14 = arith.mulf %13, %12 : vector<16x128xf32>
    %15 = arith.addf %7, %14 : vector<16x128xf32>
    %c2 = arith.constant 2 : index
    %16 = memref.load %arg1[%c2] : memref<5xf32, #tpu.memory_space<smem>>
    %c2_9 = arith.constant 2 : index
    %c0_10 = arith.constant 0 : index
    %c0_11 = arith.constant 0 : index
    %17 = vector.load %arg2[%c2_9, %c0_10, %c0_11] : memref<5x16x64xf32, #tpu.memory_space<vmem>>, vector<1x16x64xf32>
    %18 = vector.shape_cast %17 : vector<1x16x64xf32> to vector<16x64xf32>
    %19 = arith.truncf %18 : vector<16x64xf32> to vector<16x64xbf16>
    %cst_12 = arith.constant dense<0.000000e+00> : vector<16x128xf32>
    %20 = tpu.matmul %19, %0, %cst_12 {dimension_numbers = #tpu.dot_dimension_numbers<[1], [0], [0], [1], [0, 0, 1, 1], [], []>} : vector<16x64xbf16>, vector<64x128xbf16>, vector<16x128xf32> -> vector<16x128xf32>
    %21 = vector.broadcast %16 : f32 to vector<16x128xf32>
    %22 = arith.mulf %21, %20 : vector<16x128xf32>
    %23 = arith.addf %15, %22 : vector<16x128xf32>
    %c3 = arith.constant 3 : index
    %24 = memref.load %arg1[%c3] : memref<5xf32, #tpu.memory_space<smem>>
    %c3_13 = arith.constant 3 : index
    %c0_14 = arith.constant 0 : index
    %c0_15 = arith.constant 0 : index
    %25 = vector.load %arg2[%c3_13, %c0_14, %c0_15] : memref<5x16x64xf32, #tpu.memory_space<vmem>>, vector<1x16x64xf32>
    %26 = vector.shape_cast %25 : vector<1x16x64xf32> to vector<16x64xf32>
    %27 = arith.truncf %26 : vector<16x64xf32> to vector<16x64xbf16>
    %cst_16 = arith.constant dense<0.000000e+00> : vector<16x128xf32>
    %28 = tpu.matmul %27, %0, %cst_16 {dimension_numbers = #tpu.dot_dimension_numbers<[1], [0], [0], [1], [0, 0, 1, 1], [], []>} : vector<16x64xbf16>, vector<64x128xbf16>, vector<16x128xf32> -> vector<16x128xf32>
    %29 = vector.broadcast %24 : f32 to vector<16x128xf32>
    %30 = arith.mulf %29, %28 : vector<16x128xf32>
    %31 = arith.addf %23, %30 : vector<16x128xf32>
    %c4 = arith.constant 4 : index
    %32 = memref.load %arg1[%c4] : memref<5xf32, #tpu.memory_space<smem>>
    %c4_17 = arith.constant 4 : index
    %c0_18 = arith.constant 0 : index
    %c0_19 = arith.constant 0 : index
    %33 = vector.load %arg2[%c4_17, %c0_18, %c0_19] : memref<5x16x64xf32, #tpu.memory_space<vmem>>, vector<1x16x64xf32>
    %34 = vector.shape_cast %33 : vector<1x16x64xf32> to vector<16x64xf32>
    %35 = arith.truncf %34 : vector<16x64xf32> to vector<16x64xbf16>
    %cst_20 = arith.constant dense<0.000000e+00> : vector<16x128xf32>
    %36 = tpu.matmul %35, %0, %cst_20 {dimension_numbers = #tpu.dot_dimension_numbers<[1], [0], [0], [1], [0, 0, 1, 1], [], []>} : vector<16x64xbf16>, vector<64x128xbf16>, vector<16x128xf32> -> vector<16x128xf32>
    %37 = vector.broadcast %32 : f32 to vector<16x128xf32>
    %38 = arith.mulf %37, %36 : vector<16x128xf32>
    %39 = arith.addf %31, %38 : vector<16x128xf32>
    %c0_21 = arith.constant 0 : index
    %c0_22 = arith.constant 0 : index
    %40 = vector.load %arg4[%c0_21, %c0_22] : memref<1x128xf32, #tpu.memory_space<vmem>>, vector<1x128xf32>
    %cst_23 = arith.constant 2.000000e+00 : f32
    %41 = vector.broadcast %cst_23 : f32 to vector<16x128xf32>
    %42 = arith.mulf %41, %39 : vector<16x128xf32>
    %43 = vector.broadcast %40 : vector<1x128xf32> to vector<16x128xf32>
    %44 = arith.subf %43, %42 : vector<16x128xf32>
    %cst_24 = arith.constant dense<0x7F800000> : vector<16xf32>
    %45 = vector.multi_reduction <minimumf>, %44, %cst_24 [1] : vector<16x128xf32> to vector<16xf32>
    %46 = vector.shape_cast %45 : vector<16xf32> to vector<16x1xf32>
    %47 = tpu.iota {dimensions = array<i32: 1>} : vector<16x128xi32>
    %48 = vector.broadcast %46 : vector<16x1xf32> to vector<16x128xf32>
    %49 = arith.cmpf oeq, %44, %48 : vector<16x128xf32>
    %c128_i32 = arith.constant 128 : i32
    %50 = vector.broadcast %c128_i32 : i32 to vector<16x128xi32>
    %51 = arith.select %49, %47, %50 : vector<16x128xi1>, vector<16x128xi32>
    %cst_25 = arith.constant dense<2147483647> : vector<16xi32>
    %52 = vector.multi_reduction <minsi>, %51, %cst_25 [1] : vector<16x128xi32> to vector<16xi32>
    %53 = vector.shape_cast %52 : vector<16xi32> to vector<16x1xi32>
    %54 = vector.broadcast %53 : vector<16x1xi32> to vector<16x128xi32>
    %55 = arith.cmpi eq, %47, %54 : vector<16x128xi32>
    %cst_26 = arith.constant 1.000000e+03 : f32
    %cst_27 = arith.constant 0.000000e+00 : f32
    %56 = vector.broadcast %cst_26 : f32 to vector<16x128xf32>
    %57 = vector.broadcast %cst_27 : f32 to vector<16x128xf32>
    %58 = arith.select %55, %56, %57 : vector<16x128xi1>, vector<16x128xf32>
    %c0_28 = arith.constant 0 : index
    %c0_29 = arith.constant 0 : index
    %59 = vector.load %arg5[%c0_28, %c0_29] : memref<16x128xf32, #tpu.memory_space<vmem>>, vector<16x128xf32>
    tpu.vector_store %arg5[%c0_28, %c0_29], %58 {strides = array<i32>} : memref<16x128xf32, #tpu.memory_space<vmem>>, vector<16x128xf32>,
    return
  }
  func.func @transform_0(%arg0: i32) -> i32 {
    %c0_i32 = arith.constant 0 : i32
    %c0_i32_0 = arith.constant 0 : i32
    return %c0_i32 : i32
  }
  func.func @transform_1(%arg0: i32) -> (i32, i32, i32) {
    %c0_i32 = arith.constant 0 : i32
    %c0_i32_0 = arith.constant 0 : i32
    %c0_i32_1 = arith.constant 0 : i32
    return %c0_i32, %arg0, %c0_i32_0 : i32, i32, i32
  }
  func.func @transform_2(%arg0: i32) -> (i32, i32) {
    %c0_i32 = arith.constant 0 : i32
    %c0_i32_0 = arith.constant 0 : i32
    %c0_i32_1 = arith.constant 0 : i32
    return %c0_i32, %c0_i32_0 : i32, i32
  }
  func.func @transform_3(%arg0: i32) -> (i32, i32) {
    %c0_i32 = arith.constant 0 : i32
    %c0_i32_0 = arith.constant 0 : i32
    %c0_i32_1 = arith.constant 0 : i32
    return %c0_i32, %c0_i32_0 : i32, i32
  }
  func.func @transform_4(%arg0: i32) -> (i32, i32) {
    %c0_i32 = arith.constant 0 : i32
    %c0_i32_0 = arith.constant 0 : i32
    return %arg0, %c0_i32 : i32, i32
  }
}

</mosaic_0001>

<bundles_post_ra>
// kernel: tpu_custom_call.1
= control target key start
LH: loop header
LB: loop body
LE: loop exit
PB: predicated region body
PF: predicated region fallthrough
CT: control target
= control target key end

     0   :  { %9 = vsyncpa [#allocation5], 0  ;;  %s493_s0 = inlined_call_operand.hbm [shape: f32[5], index: 0, kind: input, shape index: {}]   ;;  %s494_s1 = inlined_call_operand.hbm [shape: f32[5,16,64], index: 1, kind: input, shape index: {}]   ;;  %s495_s2 = inlined_call_operand.hbm [shape: bf16[64,128], index: 2, kind: input, shape index: {}]   ;;  %s496_s3 = inlined_call_operand.vmem [shape: f32[1,128], index: 3, kind: input, shape index: {}]   ;;  %s497_s4 = inlined_call_operand.hbm [shape: f32[16,128], index: 4, kind: output, shape index: {}]  }
   0x1   :  { %10 = vsyncpa [#allocation3], 0 }
   0x2   :  { %11 = vsyncpa [#allocation8], 0 }
   0x3   :  { %12 = vsyncpa [#allocation4], 0  ;;  %s18_s17 = sshll.u32 %s493_s0, 4  ;;  %s26_s20 = sshll.u32 %s494_s1, 4  ;;  %s19_s17 = int_to_ptr.hbm [resolvable:$true] %s18_s17  ;;  %s27_s20 = int_to_ptr.hbm [resolvable:$true] %s26_s20 }
   0x4   :  { %s433_s21 = smov [#allocation2]   ;;  %s434_s22 = smov [#allocation6]  }
   0x5   :  { %21 = dma.hbm_to_smem %s19_s17, 16, %s433_s21, [#allocation5]  }
   0x6   :  { %s28_s23 = sshll.u32 %s434_s22, 4  ;;  %s435_s24 = smov 128   ;;  %s29_s23 = int_to_ptr.vmem [resolvable:$true] %s28_s23 }
   0x7   :  { %s436_s25 = smov 8   ;;  %s39_s0 = sshll.u32 %s495_s2, 4  ;;  %s40_s0 = int_to_ptr.hbm [resolvable:$true] %s39_s0 }
   0x8   :  { %34 = dma.hbm_to_vmem [thread:$0]  %s27_s20, 1280, %s29_s23, [#allocation3], %s435_s24, %s435_s24, %s436_s25  }
   0x9   :  { %s437_s28 = smov [#allocation7]   ;;  %s438_s1 = smov 64  }
   0xa   :  { %s41_s29 = sshll.u32 %s437_s28, 4  ;;  %s439_s30 = smov 4   ;;  %s42_s29 = int_to_ptr.vmem [resolvable:$true] %s41_s29 }
   0xb   :  { %47 = dma.hbm_to_vmem [thread:$0]  %s40_s0, 512, %s42_s29, [#allocation8], %s438_s1, %s438_s1, %s439_s30  }
   0xc   :  { %425 = dma.done.wait [#allocation5], 16  }
   0xd   :  { %426 = vsyncadd [#allocation5], 4294967280 }
   0xe   :  { %427 = dma.done.wait [#allocation3], 1280  }
   0xf   :  { %428 = vsyncadd [#allocation3], 4294966016 }
  0x10   :  { %429 = dma.done.wait [#allocation8], 512  }
  0x11   :  { %430 = vsyncadd [#allocation8], 4294966784 }
  0x12   :  { %62 = sfence }
  0x13   :  { %v330_v0 = vld [vmem:[#allocation7 + $0x18] sm:$0xff]  ;;  %v329_v1 = vld [vmem:[#allocation7 + $0x10] sm:$0xff]  ;;  %v328_v2 = vld [vmem:[#allocation7 + $0x8] sm:$0xff]  ;;  %vm100_vm0 = vcmask 523264   ;;  %s72_s2 = sld [smem:[#allocation2]]  ;;  %v241_v57 = vlaneseq  ;;  %s287_s14 = sshll.u32 %s497_s4, 4  ;;  %s288_s14 = int_to_ptr.hbm [resolvable:$true] %s287_s14 }
  0x14   :  { %108 = vmatpush.bf16.msra.mxu0 %v330_v0  ;;  %133 = vmatpush.bf16.msra.mxu1 %v330_v0  ;;  %v327_v3 = vld [vmem:[#allocation7] sm:$0xff]  ;;  %v73_v4 = vld [vmem:[#allocation6] sm:$0xff]  ;;  %v74_v5 = vld [vmem:[#allocation6 + $0x8] sm:$0xff]  ;;  %s319_s5 = sld [smem:[#allocation2 + $0x1]] }
  0x15   :  { %160 = vmatpush.bf16.msra.mxu2 %v330_v0  ;;  %187 = vmatpush.bf16.msra.mxu3 %v330_v0  ;;  %v123_v6 = vld [vmem:[#allocation6 + $0x10] sm:$0xff]  ;;  %v124_v7 = vld [vmem:[#allocation6 + $0x18] sm:$0xff]  ;;  %v150_v8 = vld [vmem:[#allocation6 + $0x20] sm:$0xff]  ;;  %v75_v12 = vpack.c.bf16 %v74_v5, %v73_v4  ;;  %s321_s6 = sld [smem:[#allocation2 + $0x2]]  ;;  %v242_v58 = vand.u32 127, %v241_v57 }
  0x16   :  { %v151_v9 = vld [vmem:[#allocation6 + $0x28] sm:$0xff]  ;;  %v177_v10 = vld [vmem:[#allocation6 + $0x30] sm:$0xff]  ;;  %v178_v11 = vld [vmem:[#allocation6 + $0x38] sm:$0xff]  ;;  %v125_v13 = vpack.c.bf16 %v124_v7, %v123_v6  ;;  %s323_s7 = sld [smem:[#allocation2 + $0x3]] }
  0x17   :  { %v152_v14 = vpack.c.bf16 %v151_v9, %v150_v8  ;;  %v179_v15 = vpack.c.bf16 %v178_v11, %v177_v10  ;;  %v204_v16 = vld [vmem:[#allocation6 + $0x40] sm:$0xff]  ;;  %v205_v17 = vld [vmem:[#allocation6 + $0x48] sm:$0xff]  ;;  %s325_s8 = sld [smem:[#allocation2 + $0x4]] }
  0x18   :  { %109 = vmatpush.bf16.msra.mxu0 %v329_v1  ;;  %134 = vmatpush.bf16.msra.mxu1 %v329_v1  ;;  %v206_v18 = vpack.c.bf16 %v205_v17, %v204_v16  ;;  %v340_v45 = vld [vmem:[%s496_s3] ss:$0 sm:$0xff]  ;;  %v440_v17 = vmov 0.0   ;;  %s441_s3 = smov [#allocation9]  }
  0x19   :  { %161 = vmatpush.bf16.msra.mxu2 %v329_v1  ;;  %188 = vmatpush.bf16.msra.mxu3 %v329_v1  ;;  %v118_v21 = vstv %s72_s2  ;;  %s285_s11 = sshll.u32 %s441_s3, 4  ;;  %s286_s11 = int_to_ptr.vmem [resolvable:$true] %s285_s11 }
  0x1a   :  { %v143_v22 = vstv %s319_s5 }
  0x1b   :  { %v170_v23 = vstv %s321_s6 }
  0x1c   :  { %110 = vmatpush.bf16.msra.mxu0 %v328_v2  ;;  %135 = vmatpush.bf16.msra.mxu1 %v328_v2  ;;  %v197_v30 = vstv %s323_s7 }
  0x1d   :  { %162 = vmatpush.bf16.msra.mxu2 %v328_v2  ;;  %189 = vmatpush.bf16.msra.mxu3 %v328_v2  ;;  %v224_v35 = vstv %s325_s8 }
  0x20   :  { %111 = vmatpush.bf16.msra.mxu0 %v327_v3  ;;  %136 = vmatpush.bf16.msra.mxu1 %v327_v3 }
  0x21   :  { %163 = vmatpush.bf16.msra.mxu2 %v327_v3  ;;  %190 = vmatpush.bf16.msra.mxu3 %v327_v3 }
  0x23   :  { %318 = vmatmul.msk.bf16.vlgmr.msra.gmra.mxu0 %vm100_vm0, %v75_v12  ;;  %320 = vmatmul.msk.bf16.vlgmr.msra.gmra.mxu1 %vm100_vm0, %v125_v13 }
  0x24   :  { %214 = vmatpush.bf16.msrb.mxu0 %v330_v0  ;;  %322 = vmatmul.msk.bf16.vlgmr.msra.gmra.mxu2 %vm100_vm0, %v152_v14 }
  0x25   :  { %324 = vmatmul.msk.bf16.vlgmr.msra.gmra.mxu3 %vm100_vm0, %v179_v15 }
  0x28   :  { %215 = vmatpush.bf16.msrb.mxu0 %v329_v1 }
  0x2c   :  { %216 = vmatpush.bf16.msrb.mxu0 %v328_v2 }
  0x30   :  { %217 = vmatpush.bf16.msrb.mxu0 %v327_v3 }
  0x33   :  { %326 = vmatmul.msk.bf16.vlgmr.msrb.gmra.mxu0 %vm100_vm0, %v206_v18 }
  0xa0   :  { %v113_v19 = vpop.f32.mrf.mxu0  ;;  %v138_v20 = vpop.f32.mrf.mxu1 }
  0xa1   :  { %v119_v24 = vmul.f32 %v118_v21, %v113_v19  ;;  %v144_v25 = vmul.f32 %v143_v22, %v138_v20 }
  0xa3   :  { %v146_v31 = vadd.f32 %v144_v25, %v119_v24 }
  0xa7   :  { %v165_v26 = vpop.f32.mrf.mxu2 }
  0xa8   :  { %v115_v27 = vpop.f32.mrf.mxu0  ;;  %v171_v28 = vmul.f32 %v170_v23, %v165_v26  ;;  %v192_v29 = vpop.f32.mrf.mxu3 }
  0xa9   :  { %v140_v32 = vpop.f32.mrf.mxu1  ;;  %v198_v34 = vmul.f32 %v197_v30, %v192_v29  ;;  %v120_v36 = vmul.f32 %v118_v21, %v115_v27 }
  0xaa   :  { %v173_v33 = vadd.f32 %v171_v28, %v146_v31  ;;  %v145_v37 = vmul.f32 %v143_v22, %v140_v32 }
  0xac   :  { %v200_v40 = vadd.f32 %v198_v34, %v173_v33  ;;  %v147_v43 = vadd.f32 %v145_v37, %v120_v36 }
  0xaf   :  { %v167_v38 = vpop.f32.mrf.mxu2 }
  0xb0   :  { %v219_v39 = vpop.f32.mrf.mxu0  ;;  %v172_v41 = vmul.f32 %v170_v23, %v167_v38  ;;  %v194_v46 = vpop.f32.mrf.mxu3 }
  0xb1   :  { %v225_v42 = vmul.f32 %v224_v35, %v219_v39  ;;  %v199_v49 = vmul.f32 %v197_v30, %v194_v46 }
  0xb2   :  { %v174_v47 = vadd.f32 %v172_v41, %v147_v43 }
  0xb3   :  { %v227_v44 = vadd.f32 %v225_v42, %v200_v40 }
  0xb4   :  { %v201_v52 = vadd.f32 %v199_v49, %v174_v47 }
  0xb5   :  { %v230_v48 = vmul.f32 2.0, %v227_v44 }
  0xb7   :  { %v235_v50 = vsub.f32 %v340_v45, %v230_v48 }
  0xb8   :  { %v221_v51 = vpop.f32.mrf.mxu0 }
  0xb9   :  { %v226_v53 = vmul.f32 %v224_v35, %v221_v51  ;;  %237 = vmin.xlane.f32.xlu0 %v235_v50 }
  0xbb   :  { %v228_v54 = vadd.f32 %v226_v53, %v201_v52 }
  0xbd   :  { %v231_v55 = vmul.f32 2.0, %v228_v54 }
  0xbf   :  { %v236_v56 = vsub.f32 %v340_v45, %v231_v55 }
  0xc1   :  { %239 = vmin.xlane.f32.xlu0 %v236_v56 }
 0x12c   :  { %v238_v59 = vpop.xlane.xlu0 %237 }
 0x12d   :  { %vm243_vm1 = vcmp.eq.f32.partialorder %v235_v50, %v238_v59 }
 0x12e   :  { %v245_v60 = vsel %vm243_vm1, %v242_v58, 128 }
 0x12f   :  { %v248_v61 = vshra.s32 %v245_v60, 16  ;;  %v247_v3 = vand.u32 65535, %v245_v60 }
 0x131   :  { %v250_v62 = vcvt.s32.f32 %v248_v61  ;;  %v249_v5 = vcvt.s32.f32 %v247_v3 }
 0x133   :  { %251 = vmin.xlane.f32.xlu1 %v250_v62 }
 0x134   :  { %v240_v63 = vpop.xlane.xlu0 %239 }
 0x135   :  { %vm244_vm2 = vcmp.eq.f32.partialorder %v236_v56, %v240_v63 }
 0x136   :  { %v246_v0 = vsel %vm244_vm2, %v242_v58, 128 }
 0x137   :  { %v262_v1 = vshra.s32 %v246_v0, 16  ;;  %v261_v7 = vand.u32 65535, %v246_v0 }
 0x139   :  { %v264_v2 = vcvt.s32.f32 %v262_v1  ;;  %v263_v9 = vcvt.s32.f32 %v261_v7 }
 0x13b   :  { %265 = vmin.xlane.f32.xlu1 %v264_v2 }
 0x1a6   :  { %v252_v4 = vpop.xlane.xlu1 %251 }
 0x1a7   :  { %vm253_vm3 = vcmp.eq.f32.partialorder %v250_v62, %v252_v4  ;;  %v258_v11 = vcvt.f32.s32 %v252_v4 }
 0x1a8   :  { %v254_v6 = vsel %vm253_vm3, %v249_v5, inf }
 0x1a9   :  { %255 = vmin.xlane.f32.xlu2 %v254_v6  ;;  %v259_v13 = vshll.u32 %v258_v11, 16 }
 0x1ae   :  { %v266_v8 = vpop.xlane.xlu1 %265 }
 0x1af   :  { %vm267_vm4 = vcmp.eq.f32.partialorder %v264_v2, %v266_v8  ;;  %v272_v16 = vcvt.f32.s32 %v266_v8 }
 0x1b0   :  { %v268_v10 = vsel %vm267_vm4, %v263_v9, inf }
 0x1b1   :  { %269 = vmin.xlane.f32.xlu2 %v268_v10  ;;  %v273_v20 = vshll.u32 %v272_v16, 16 }
 0x21c   :  { %v256_v12 = vpop.xlane.xlu2 %255 }
 0x21d   :  { %v257_v14 = vcvt.f32.s32 %v256_v12 }
 0x21f   :  { %v260_v15 = vadd.s32 %v259_v13, %v257_v14 }
 0x221   :  { %vm275_vm5 = vcmp.eq.s32.totalorder %v242_v58, %v260_v15 }
 0x222   :  { %v277_v18 = vsel %vm275_vm5, 1000.0, %v440_v17 }
 0x223   :  { %279 = vst [vmem:[#allocation9] sm:$0xff] %v277_v18 }
 0x224   :  { %v270_v19 = vpop.xlane.xlu2 %269 }
 0x225   :  { %v271_v21 = vcvt.f32.s32 %v270_v19 }
 0x227   :  { %v274_v22 = vadd.s32 %v273_v20, %v271_v21 }
 0x229   :  { %vm276_vm6 = vcmp.eq.s32.totalorder %v242_v58, %v274_v22 }
 0x22a   :  { %v278_v23 = vsel %vm276_vm6, 1000.0, %v440_v17 }
 0x22b   :  { %280 = vst [vmem:[#allocation9 + $0x8] sm:$0xff] %v278_v23 }
 0x22c   :  { %293 = dma.vmem_to_hbm [thread:$0]  %s286_s11, 256, %s288_s14, [#allocation4], %s435_s24, %s435_s24, %s436_s25  }
 0x22d   :  { %431 = dma.done.wait [#allocation4], 256  }
 0x22e   :  { %432 = vsyncadd [#allocation4], 4294967040 }
 0x22f   :  { %298 = vsyncpa [#allocation3], 1 }
 0x230   :  { %299 = vsyncpa [#allocation8], 1 }
 0x231   :  { %300 = vsyncpa [#allocation4], 1 }
 0x232   :  { %301 = vsyncpa [#allocation5], 1 }

</bundles_post_ra>
